<compile_context>
chip_gen: v7x
topology: tpu7x:2x2x1
jax: 0.10.0
libtpu: 0.0.40
codegen_flags: <defaults>
</compile_context>

<pallas_src>
import functools
import math

import jax
import jax.numpy as jnp
from jax.experimental import pallas as pl
from jax.experimental.pallas import tpu as pltpu


def _round_up(x, m):
    return ((x + m - 1) // m) * m


# ------------------------------ Pallas kernel --------------------------------
def _conv3x3_kernel(x_ref, w_ref, b_ref, o_ref, *, wp, l_out, kh, kw,
                    cin_pad, taps_per_group):
    """One (batch, Cout-tile) block of weight-normed 3x3 conv + bias + ReLU.

    x_ref: (1, C_pad, Lin)    bf16, spatially padded image, (H,W) -> lane axis
    w_ref: (G, cout_tile, Kg) bf16, Kg = taps_per_group * C_pad (tap-major)
    b_ref: (cout_tile, 1)     f32
    o_ref: (1, cout_tile, L)  L = H * Wp (width-extended, lane dense)
    """
    x = x_ref[0]                                    # (C_pad, Lin) bf16
    acc = None
    g_idx = 0
    for i in range(kh):
        for j0 in range(0, kw, taps_per_group):
            js = range(j0, min(j0 + taps_per_group, kw))
            # static lane-offset slices of the VMEM-resident image (no im2col)
            slices = [x[:, i * wp + j: i * wp + j + l_out] for j in js]
            xs = slices[0] if len(slices) == 1 else jnp.concatenate(slices, axis=0)
            # bf16 MXU dot, f32 accumulation; multi-dot accumulate form.
            d = jnp.dot(w_ref[g_idx], xs, preferred_element_type=jnp.float32)
            acc = d if acc is None else acc + d
            g_idx += 1
    acc = acc + b_ref[...]                          # bias broadcast over lanes
    o_ref[0] = jnp.maximum(acc, 0.0).astype(o_ref.dtype)


# ------------------------------ JAX wrappers ----------------------------------
def _weight_norm(v, g):
    """PyTorch weight_norm, dim=0: w = g * v / ||v|| (norm over all dims but 0)."""
    norm = jnp.sqrt(jnp.sum(v * v, axis=(1, 2, 3), keepdims=True))
    return v * (g.reshape(-1, 1, 1, 1) / norm)


def _vmem_limit_bytes():
    """Per-generation VMEM budget (~3/4 of physical: ~96 MiB v5e/v6e, ~48 MiB v7x)."""
    try:
        cap = pltpu.get_tpu_info().vmem_capacity_bytes
    except Exception:
        cap = 64 * 1024 * 1024
    return max(32 * 1024 * 1024, (cap * 3) // 4)


def conv3x3_wn_bias_relu_ext(x_nchw, v, g, b):
    """weight_norm(Conv2d(C, Cout, 3, stride=1, padding=1)) + bias + ReLU.

    x: (N, C, H, W) NCHW -> returns WIDTH-EXTENDED output (N, Cout, H, W+2);
    the trailing 2 columns of each row are junk (wrap-around reads) and MUST
    be cropped by the caller (after pixel shuffle they land at width >= W*r).
    """
    N, C, H, W = x_nchw.shape
    Cout, Cin, KH, KW = v.shape
    assert Cin == C and KH == 3 and KW == 3
    # TODO(synk): grouped conv (groups > 1) not implemented; module default group=1.

    C_pad = _round_up(C, 8)
    # MXU contraction fill: per-tap dots once C_pad alone reaches 128; else
    # group the 3 taps of a kernel row so Kg = 3*C_pad (temp is only one
    # 3*C_pad x L bf16 slab, not the full 9-tap im2col).
    taps_per_group = 1 if C_pad >= 128 else KW
    n_groups = KH * (KW // taps_per_group)
    Kg = taps_per_group * C_pad

    # Cout tiling: one tile when small, 256-wide tiles (MXU-friendly) otherwise.
    cout_tile = _round_up(Cout, 8)
    if cout_tile > 256:
        cout_tile = 256
    Cout_pad = _round_up(Cout, cout_tile)

    # weight_norm, pad channels/Cout, regroup tap-major / channel-minor, bf16.
    w = _weight_norm(v, g)                                         # (Cout,C,3,3)
    w = jnp.pad(w, ((0, Cout_pad - Cout), (0, C_pad - C), (0, 0), (0, 0)))
    wt = jnp.transpose(w, (2, 3, 0, 1))                            # (KH,KW,Co,Ci)
    wt = wt.reshape(KH, KW // taps_per_group, taps_per_group, Cout_pad, C_pad)
    wt = jnp.transpose(wt, (0, 1, 3, 2, 4))
    w3 = wt.reshape(n_groups, Cout_pad, Kg).astype(jnp.bfloat16)   # bf16 in HBM
    b_col = jnp.pad(b, (0, Cout_pad - Cout)).reshape(Cout_pad, 1)  # f32

    Wp = W + 2                   # 1 left + 1 right pad
    Hp = H + 3                   # 1 top pad, 1 bottom pad, +1 slack row
    Lin = Hp * Wp
    L = H * Wp                   # width-extended (lane-dense) output length

    # Only HBM-side prep: pad channels + borders, flatten (H,W) -> lanes, bf16.
    x_p = jnp.pad(x_nchw, ((0, 0), (0, C_pad - C), (1, 2), (1, 1)))
    x_flat = x_p.reshape(N, C_pad, Lin).astype(jnp.bfloat16)

    kernel = functools.partial(_conv3x3_kernel, wp=Wp, l_out=L, kh=KH, kw=KW,
                               cin_pad=C_pad, taps_per_group=taps_per_group)

    flops = 2 * N * Cout_pad * (KH * KW * C_pad) * L
    bytes_accessed = (2 * (x_flat.size + w3.size) + 4 * b_col.size
                      + 4 * N * Cout_pad * L)

    # TODO(synk): row-band spatial tiling with a 2-row halo (for very large H*W
    # on v7x's 64 MiB VMEM) is not implemented; one padded image per grid step.
    out_ext = pl.pallas_call(
        kernel,
        out_shape=jax.ShapeDtypeStruct((N, Cout_pad, L), jnp.float32),
        grid_spec=pltpu.PrefetchScalarGridSpec(
            num_scalar_prefetch=0,
            grid=(N, Cout_pad // cout_tile),
            in_specs=[
                pl.BlockSpec((1, C_pad, Lin), lambda n, c: (n, 0, 0)),     # image
                pl.BlockSpec((n_groups, cout_tile, Kg), lambda n, c: (0, c, 0)),
                pl.BlockSpec((cout_tile, 1), lambda n, c: (c, 0)),         # bias
            ],
            out_specs=pl.BlockSpec((1, cout_tile, L), lambda n, c: (n, c, 0)),
        ),
        compiler_params=pltpu.CompilerParams(
            dimension_semantics=("parallel", "parallel"),
            vmem_limit_bytes=_vmem_limit_bytes(),
        ),
        cost_estimate=pl.CostEstimate(
            flops=flops, transcendentals=0, bytes_accessed=bytes_accessed),
    )(x_flat, w3, b_col)

    # channel-major, width-extended conv output (junk columns W, W+1 per row)
    return out_ext[:, :Cout].reshape(N, Cout, H, Wp)


def _pixel_shuffle_crop(x_ext, r, w_true):
    """nn.PixelShuffle(r) on a width-extended (N, C*r*r, H, W+2) tensor.
    The junk input columns map to output width >= w_true*r, so one crop here
    preserves correctness (do NOT remove — junk lanes hold wrap-around data)."""
    # TODO(synk): PixelShuffle is pure data movement; left to XLA reshape/transpose.
    N, Crr, H, Wp = x_ext.shape
    C = Crr // (r * r)
    x = x_ext.reshape(N, C, r, r, H, Wp)
    x = jnp.transpose(x, (0, 1, 4, 2, 5, 3))
    return x.reshape(N, C, H * r, Wp * r)[:, :, :, :w_true * r]


def _pixel_shuffle(x, r):
    """Plain PyTorch nn.PixelShuffle(r): (N, C*r*r, H, W) -> (N, C, H*r, W*r)."""
    N, Crr, H, W = x.shape
    C = Crr // (r * r)
    x = x.reshape(N, C, r, r, H, W)
    x = jnp.transpose(x, (0, 1, 4, 2, 5, 3))
    return x.reshape(N, C, H * r, W * r)


def _scale_to_stages(scale):
    if scale in (2, 4, 8):
        return 2, int(round(math.log2(scale)))
    if scale in (3, 5):
        return scale, 1
    raise ValueError(f"unsupported scale {scale}")


def upsample_block(x, stage_params, *, scale):
    """Forward of _UpsampleBlock: [wn(conv3x3) -> ReLU -> PixelShuffle(r)] xN."""
    r, _ = _scale_to_stages(scale)
    out = x
    for (v, g, b) in stage_params:
        W = out.shape[3]
        out_ext = conv3x3_wn_bias_relu_ext(out, v, g, b)   # (N, Cout, H, W+2)
        out = _pixel_shuffle_crop(out_ext, r, W)           # (N, C, H*r, W*r)
    return out


def make_params(key, n_channels, scale):
    r, n_stages = _scale_to_stages(scale)
    params = []
    for _ in range(n_stages):
        key, kv, kg, kb = jax.random.split(key, 4)
        cout = r * r * n_channels
        v = jax.random.normal(kv, (cout, n_channels, 3, 3), jnp.float32) * 0.1
        g = jax.random.uniform(kg, (cout,), jnp.float32, minval=0.5, maxval=1.5)
        b = jax.random.normal(kb, (cout,), jnp.float32) * 0.1
        params.append((v, g, b))
    return params


def reference(x, stage_params, *, scale):
    """Plain-JAX reference (lax.conv) for correctness checking."""
    r, _ = _scale_to_stages(scale)
    out = x
    for (v, g, b) in stage_params:
        w = _weight_norm(v, g)
        out = jax.lax.conv_general_dilated(
            out, w, window_strides=(1, 1), padding=[(1, 1), (1, 1)],
            dimension_numbers=("NCHW", "OIHW", "NCHW"))
        out = jnp.maximum(out + b.reshape(1, -1, 1, 1), 0.0)
        out = _pixel_shuffle(out, r)
    return out


# ---------------------------------- main --------------------------------------
if __name__ == "__main__":
    key = jax.random.PRNGKey(0)
    k_x, k_p = jax.random.split(key)

    N, C, H, W = 2, 4, 16, 16
    scale = 2

    x = jax.random.normal(k_x, (N, C, H, W), dtype=jnp.float32)
    params = make_params(k_p, C, scale)

    fwd = jax.jit(functools.partial(upsample_block, scale=scale))
    out = fwd(x, params)
    jax.block_until_ready(out)

    ref = reference(x, params, scale=scale)
    assert out.shape == (N, C, H * scale, W * scale), out.shape
    err = float(jnp.max(jnp.abs(out - ref)))
    # bf16 matmul operands with f32 accumulation -> relaxed tolerance
    assert err < 5e-2, f"max abs err {err}"

    print("KERNEL_OK")
</pallas_src>

<mosaic_0001>
module attributes {stable_mosaic.version = 11 : i64} {
  func.func @_conv3x3_kernel(%arg0: i32, %arg1: i32, %arg2: memref<1x8x342xbf16, #tpu.memory_space<vmem>>, %arg3: memref<3x16x24xbf16, #tpu.memory_space<vmem>>, %arg4: memref<16x1xf32, #tpu.memory_space<vmem>>, %arg5: memref<1x16x288xf32, #tpu.memory_space<vmem>>) attributes {dimension_semantics = [#tpu.dimension_semantics<parallel>, #tpu.dimension_semantics<parallel>], iteration_bounds = array<i64: 2, 1>, scalar_prefetch = 0 : i64, scratch_operands = 0 : i64, tpu.core_type = #tpu.core_type<tc>, window_params = [{transform_indices = @transform_0, window_bounds = array<i64: 1, 8, 342>}, {transform_indices = @transform_1, window_bounds = array<i64: 3, 16, 24>}, {transform_indices = @transform_2, window_bounds = array<i64: 16, 1>}, {transform_indices = @transform_3, window_bounds = array<i64: 1, 16, 288>}]} {
    %c0 = arith.constant 0 : index
    %c0_0 = arith.constant 0 : index
    %c0_1 = arith.constant 0 : index
    %0 = vector.load %arg2[%c0, %c0_0, %c0_1] : memref<1x8x342xbf16, #tpu.memory_space<vmem>>, vector<1x8x342xbf16>
    %1 = vector.shape_cast %0 : vector<1x8x342xbf16> to vector<8x342xbf16>
    %2 = vector.extract_strided_slice %1 {offsets = [0, 0], sizes = [8, 288], strides = [1, 1]} : vector<8x342xbf16> to vector<8x288xbf16>
    %3 = vector.extract_strided_slice %1 {offsets = [0, 1], sizes = [8, 288], strides = [1, 1]} : vector<8x342xbf16> to vector<8x288xbf16>
    %4 = vector.extract_strided_slice %1 {offsets = [0, 2], sizes = [8, 288], strides = [1, 1]} : vector<8x342xbf16> to vector<8x288xbf16>
    %5 = tpu.concatenate %2, %3, %4 in 0 : vector<8x288xbf16>, vector<8x288xbf16>, vector<8x288xbf16> -> vector<24x288xbf16>
    %c0_2 = arith.constant 0 : index
    %c0_3 = arith.constant 0 : index
    %c0_4 = arith.constant 0 : index
    %6 = vector.load %arg3[%c0_2, %c0_3, %c0_4] : memref<3x16x24xbf16, #tpu.memory_space<vmem>>, vector<1x16x24xbf16>
    %7 = vector.shape_cast %6 : vector<1x16x24xbf16> to vector<16x24xbf16>
    %cst = arith.constant dense<0.000000e+00> : vector<16x288xf32>
    %8 = tpu.matmul %7, %5, %cst {dimension_numbers = #tpu.dot_dimension_numbers<[1], [0], [0], [1], [0, 0, 1, 1], [], []>} : vector<16x24xbf16>, vector<24x288xbf16>, vector<16x288xf32> -> vector<16x288xf32>
    %9 = vector.extract_strided_slice %1 {offsets = [0, 18], sizes = [8, 288], strides = [1, 1]} : vector<8x342xbf16> to vector<8x288xbf16>
    %10 = vector.extract_strided_slice %1 {offsets = [0, 19], sizes = [8, 288], strides = [1, 1]} : vector<8x342xbf16> to vector<8x288xbf16>
    %11 = vector.extract_strided_slice %1 {offsets = [0, 20], sizes = [8, 288], strides = [1, 1]} : vector<8x342xbf16> to vector<8x288xbf16>
    %12 = tpu.concatenate %9, %10, %11 in 0 : vector<8x288xbf16>, vector<8x288xbf16>, vector<8x288xbf16> -> vector<24x288xbf16>
    %c1 = arith.constant 1 : index
    %c0_5 = arith.constant 0 : index
    %c0_6 = arith.constant 0 : index
    %13 = vector.load %arg3[%c1, %c0_5, %c0_6] : memref<3x16x24xbf16, #tpu.memory_space<vmem>>, vector<1x16x24xbf16>
    %14 = vector.shape_cast %13 : vector<1x16x24xbf16> to vector<16x24xbf16>
    %cst_7 = arith.constant dense<0.000000e+00> : vector<16x288xf32>
    %15 = tpu.matmul %14, %12, %cst_7 {dimension_numbers = #tpu.dot_dimension_numbers<[1], [0], [0], [1], [0, 0, 1, 1], [], []>} : vector<16x24xbf16>, vector<24x288xbf16>, vector<16x288xf32> -> vector<16x288xf32>
    %16 = arith.addf %8, %15 : vector<16x288xf32>
    %17 = vector.extract_strided_slice %1 {offsets = [0, 36], sizes = [8, 288], strides = [1, 1]} : vector<8x342xbf16> to vector<8x288xbf16>
    %18 = vector.extract_strided_slice %1 {offsets = [0, 37], sizes = [8, 288], strides = [1, 1]} : vector<8x342xbf16> to vector<8x288xbf16>
    %19 = vector.extract_strided_slice %1 {offsets = [0, 38], sizes = [8, 288], strides = [1, 1]} : vector<8x342xbf16> to vector<8x288xbf16>
    %20 = tpu.concatenate %17, %18, %19 in 0 : vector<8x288xbf16>, vector<8x288xbf16>, vector<8x288xbf16> -> vector<24x288xbf16>
    %c2 = arith.constant 2 : index
    %c0_8 = arith.constant 0 : index
    %c0_9 = arith.constant 0 : index
    %21 = vector.load %arg3[%c2, %c0_8, %c0_9] : memref<3x16x24xbf16, #tpu.memory_space<vmem>>, vector<1x16x24xbf16>
    %22 = vector.shape_cast %21 : vector<1x16x24xbf16> to vector<16x24xbf16>
    %cst_10 = arith.constant dense<0.000000e+00> : vector<16x288xf32>
    %23 = tpu.matmul %22, %20, %cst_10 {dimension_numbers = #tpu.dot_dimension_numbers<[1], [0], [0], [1], [0, 0, 1, 1], [], []>} : vector<16x24xbf16>, vector<24x288xbf16>, vector<16x288xf32> -> vector<16x288xf32>
    %24 = arith.addf %16, %23 : vector<16x288xf32>
    %c0_11 = arith.constant 0 : index
    %c0_12 = arith.constant 0 : index
    %25 = vector.load %arg4[%c0_11, %c0_12] : memref<16x1xf32, #tpu.memory_space<vmem>>, vector<16x1xf32>
    %26 = vector.broadcast %25 : vector<16x1xf32> to vector<16x288xf32>
    %27 = arith.addf %24, %26 : vector<16x288xf32>
    %cst_13 = arith.constant 0.000000e+00 : f32
    %28 = vector.broadcast %cst_13 : f32 to vector<16x288xf32>
    %29 = arith.maximumf %27, %28 : vector<16x288xf32>
    %c0_14 = arith.constant 0 : index
    %c0_15 = arith.constant 0 : index
    %c0_16 = arith.constant 0 : index
    %30 = vector.load %arg5[%c0_14, %c0_15, %c0_16] : memref<1x16x288xf32, #tpu.memory_space<vmem>>, vector<1x16x288xf32>
    %31 = vector.shape_cast %30 : vector<1x16x288xf32> to vector<16x288xf32>
    %32 = vector.shape_cast %29 : vector<16x288xf32> to vector<1x16x288xf32>
    tpu.vector_store %arg5[%c0_14, %c0_15, %c0_16], %32 {strides = array<i32>} : memref<1x16x288xf32, #tpu.memory_space<vmem>>, vector<1x16x288xf32>,
    return
  }
  func.func @transform_0(%arg0: i32, %arg1: i32) -> (i32, i32, i32) {
    %c0_i32 = arith.constant 0 : i32
    %c0_i32_0 = arith.constant 0 : i32
    %c0_i32_1 = arith.constant 0 : i32
    return %arg0, %c0_i32, %c0_i32_0 : i32, i32, i32
  }
  func.func @transform_1(%arg0: i32, %arg1: i32) -> (i32, i32, i32) {
    %c0_i32 = arith.constant 0 : i32
    %c0_i32_0 = arith.constant 0 : i32
    %c0_i32_1 = arith.constant 0 : i32
    return %c0_i32, %arg1, %c0_i32_0 : i32, i32, i32
  }
  func.func @transform_2(%arg0: i32, %arg1: i32) -> (i32, i32) {
    %c0_i32 = arith.constant 0 : i32
    %c0_i32_0 = arith.constant 0 : i32
    return %arg1, %c0_i32 : i32, i32
  }
  func.func @transform_3(%arg0: i32, %arg1: i32) -> (i32, i32, i32) {
    %c0_i32 = arith.constant 0 : i32
    %c0_i32_0 = arith.constant 0 : i32
    return %arg0, %arg1, %c0_i32 : i32, i32, i32
  }
}

</mosaic_0001>

<bundles_post_ra>
// kernel: upsample_block.1
= control target key start
LH: loop header
LB: loop body
LE: loop exit
PB: predicated region body
PF: predicated region fallthrough
CT: control target
= control target key end

     0   :  { %s954_s12 = smov 0   ;;  %s956_s13 = smov 0   ;;  %s1049_s0 = inlined_call_operand.vmem [shape: bf16[2,8,342], index: 0, kind: input, shape index: {}]   ;;  %s1050_s1 = inlined_call_operand.vmem [shape: bf16[3,16,24], index: 1, kind: input, shape index: {}]   ;;  %s1051_s2 = inlined_call_operand.vmem [shape: f32[16,1], index: 2, kind: input, shape index: {}]   ;;  %s1052_s3 = inlined_call_operand.vmem [shape: f32[2,16,288], index: 3, kind: output, shape index: {}]  }
   0x1   :  { %s958_s14 = smov 0  }
   0x2 LB: > { %s25_s15 = sadd.s32 1, %s921_s13  ;;  %p797_p0 = scmp.ge.s32.totalorder %s925_s14, 1  ;;  %s925_s14 = sphi %s958_s14, %s13_s14   ;;  %s921_s13 = sphi %s956_s13, %s1054_s13   ;;  %s917_s12 = sphi %s954_s12, %s1053_s12  }
   0x3   : > { %p27_p1 = scmp.ge.s32.totalorder %s25_s15, 2  ;;  %p173_p2 = scmp.lt.s32.totalorder %s925_s14, 3 }
   0x5   : > { %s1056_s15 = smov (%p27_p1, %s25_s15), 0  ;;  %p174_p3 = pnand %p797_p0, %p173_p2 }
   0x6   : > { %p212_p4 = scmp.lt.s32.totalorder (!%p174_p3), %s917_s12, 1  ;;  %s927_s20 = smov (!%p174_p3), 127   ;;  %v929_v4 = vmov (!%p174_p3), 0.0   ;;  %vm257_vm0 = vcmask (!%p174_p3), 1039360   ;;  %vm269_vm1 = vcmask (!%p174_p3), 1043456   ;;  %vm930_vm2 = vmmov (!%p174_p3), 0  }
   0x7   : > { %177 = sbr.rel (%p174_p3) target bundleno = 514 (0x202), region = 32  ;;  %s928_s21 = smov (!%p174_p3), 126   ;;  %830 = vmatprep.subr.bf16.mxu1 (!%p174_p3), %v929_v4  ;;  %834 = vmatprep.mubr.msk.bf16.mxu1 (!%p174_p3), %vm930_vm2, %v929_v4  ;;  %vm266_vm3 = vcmask (!%p174_p3), 1031168   ;;  %v932_v12 = vmov (!%p174_p3), 0   ;;  %v643_v19 = vld [vmem:[%s1051_s2] sm:$0xff] (!%p174_p3)  ;;  %v644_v20 = vld [vmem:[%s1051_s2 + $0x8] sm:$0xff] (!%p174_p3) }
   0x8   : > { %s931_s22 = smov (!%p174_p3), 110   ;;  %360 = vmatprep.mubr.bf16.mxu0 (!%p174_p3), %v932_v12  ;;  %896 = vset.pattern.permute.xlu1 (!%p174_p3), %v932_v12  ;;  %s933_s23 = smov (!%p174_p3), 92   ;;  %vm307_vm4 = vcmask (!%p174_p3), 900096   ;;  %v900_v30 = vld [vmem:[%s1050_s1 + $0x8] sm:$0xff] (!%p174_p3)   ;;  %vm315_vm5 = vcmask (!%p174_p3), 195584   ;;  %vm533_vm6 = vcmask (!%p174_p3), 752640  }
   0x9   : > { %895 = vset.pattern.permute.xlu0 (!%p174_p3), %v932_v12  ;;  %v901_v38 = vld [vmem:[%s1050_s1] sm:$0xff] (!%p174_p3)   ;;  %v902_v45 = vld [vmem:[%s1050_s1 + $0x10] sm:$0xff] (!%p174_p3)   ;;  %vm669_vm7 = vcmask (!%p174_p3), 261120  }
   0xe   : > { %s1058_s12 = smov (!%p212_p4, %s917_s12), 1 }
   0xf   : > { %s862_s16 = smul.u32 12, %s1058_s12 }
  0x10   : > { %s863_s7 = smul.u32 48, %s1058_s12 }
  0x11   : > { %s216_s19 = scalar_lea.vmem %s1049_s0, %s862_s16 }
  0x12   : > { %v241_v0 = vld [vmem:[%s216_s19] sm:$0xff]  ;;  %v899_v3 = vld [vmem:[%s216_s19 + $0x8] ss:$0 sps:$4 sm:$0xff]   ;;  %s238_s10 = scalar_lea.vmem %s1052_s3, %s863_s7 }
  0x13   : > { %v801_v1 = vcombine.high %v241_v0, %v241_v0  ;;  %v800_v2 = vcombine.low %v241_v0, %v241_v0 }
  0x15   : > { %253 = vrot.lane.b32.xlu0 %v801_v1, %s927_s20  ;;  %251 = vrot.lane.b32.xlu1 %v800_v2, %s927_s20 }
  0x19   : > { %255 = vrot.lane.b32.xlu0 %v899_v3, %s927_s20  ;;  %260 = vrot.lane.b32.xlu1 %v800_v2, %s928_s21 }
  0x1d   : > { %262 = vrot.lane.b32.xlu0 %v801_v1, %s928_s21  ;;  %264 = vrot.lane.b32.xlu1 %v899_v3, %s928_s21 }
  0x87   : > { %v254_v5 = vpop.permute.xlu0 %253  ;;  %v252_v6 = vpop.permute.xlu1 %251 }
  0x88   : > { %v258_v13 = vsel %vm257_vm0, %v252_v6, %v254_v5 }
  0x89   : > { %v272_v16 = vsel %vm269_vm1, %v800_v2, %v258_v13 }
  0x8b   : > { %v256_v7 = vpop.permute.xlu0 %255  ;;  %v261_v9 = vpop.permute.xlu1 %260 }
  0x8c   : > { %v259_v8 = vsel %vm257_vm0, %v254_v5, %v256_v7  ;;  %v280_v10 = vsel %vm269_vm1, %v899_v3, %v256_v7 }
  0x8d   : > { %299 = vrot.lane.b32.xlu1 %v280_v10, %s931_s22  ;;  %v276_v11 = vsel %vm269_vm1, %v801_v1, %v259_v8 }
  0x8e   : > { %297 = vrot.lane.b32.xlu0 %v276_v11, %s931_s22 }
  0x8f   : > { %v263_v14 = vpop.permute.xlu0 %262  ;;  %v265_v17 = vpop.permute.xlu1 %264 }
  0x90   : > { %v267_v15 = vsel %vm266_vm3, %v261_v9, %v263_v14  ;;  %v268_v18 = vsel %vm266_vm3, %v263_v14, %v265_v17  ;;  %v427_v37 = vsel %vm269_vm1, %v265_v17, 0 }
  0x91   : > { %301 = vrot.lane.b32.xlu1 %v267_v15, %s931_s22  ;;  %v421_v40 = vsel %vm269_vm1, %v267_v15, 0 }
  0x92   : > { %295 = vrot.lane.b32.xlu0 %v272_v16, %s931_s22 }
  0x95   : > { %305 = vrot.lane.b32.xlu1 %v265_v17, %s931_s22 }
  0x96   : > { %303 = vrot.lane.b32.xlu0 %v268_v18, %s931_s22 }
  0x99   : > { %525 = vrot.lane.b32.xlu1 %v280_v10, %s933_s23 }
  0x9a   : > { %523 = vrot.lane.b32.xlu0 %v276_v11, %s933_s23 }
  0x9d   : > { %527 = vrot.lane.b32.xlu1 %v267_v15, %s933_s23 }
  0x9e   : > { %521 = vrot.lane.b32.xlu0 %v272_v16, %s933_s23 }
  0xa1   : > { %531 = vrot.lane.b32.xlu1 %v265_v17, %s933_s23 }
  0xa2   : > { %529 = vrot.lane.b32.xlu0 %v268_v18, %s933_s23 }
  0xa5   : > { %652 = vperm.xlu1 %896, %v644_v20  }
  0xa6   : > { %647 = vperm.xlu0 %895, %v643_v19  }
  0xff   : > { %v300_v21 = vpop.permute.xlu1 %299 }
 0x100   : > { %v298_v22 = vpop.permute.xlu0 %297  ;;  %831 = vmatpush3.bf16.msra.mxu1 %v300_v21 }
 0x101   : > { %v309_v23 = vsel %vm307_vm4, %v298_v22, %v300_v21  ;;  %832 = vmatprep.subr.bf16.mxu1 %v929_v4 }
 0x102   : > { %328 = vmatprep.subr.bf16.mxu0 %v309_v23 }
 0x103   : > { %v302_v24 = vpop.permute.xlu1 %301 }
 0x104   : > { %v296_v25 = vpop.permute.xlu0 %295 }
 0x105   : > { %v308_v26 = vsel %vm307_vm4, %v296_v25, %v298_v22 }
 0x106   : > { %329 = vmatpush1.bf16.msra.mxu0 %v308_v26 }
 0x107   : > { %v306_v27 = vpop.permute.xlu1 %305 }
 0x108   : > { %v304_v28 = vpop.permute.xlu0 %303  ;;  %v326_v29 = vsel %vm269_vm1, %v306_v27, 0 }
 0x109   : > { %v310_v31 = vsel %vm307_vm4, %v302_v24, %v304_v28  ;;  %v311_v32 = vsel %vm307_vm4, %v304_v28, %v306_v27  ;;  %833 = vmatpush3.bf16.msra.mxu1 %v326_v29 }
 0x10a   : > { %806 = vmatprep.subr.msk.bf16.mxu0 %vm269_vm1, %v311_v32  ;;  %v320_v33 = vsel %vm269_vm1, %v310_v31, 0  ;;  %838 = vmatprep.subr.bf16.mxu1 %v929_v4 }
 0x10b   : > { %331 = vmatpush1.bf16.msra.mxu0 %v320_v33  ;;  %v526_v34 = vpop.permute.xlu1 %525 }
 0x10c   : > { %v524_v35 = vpop.permute.xlu0 %523  ;;  %835 = vmatmul.mubr.msk.bf16.vlgmr.msra.gmra.mrb[0].mxu1 %vm315_vm5, %v900_v30  ;;  %429 = vmatprep.subr.bf16.mxu0 %v276_v11 }
 0x10d   : > { %839 = vmatpush3.bf16.msra.mxu1 %v280_v10  ;;  %842 = vmatprep.mubr.msk.bf16.mxu1 %vm930_vm2, %v929_v4  ;;  %v535_v41 = vsel %vm533_vm6, %v524_v35, %v526_v34 }
 0x10e   : > { %807 = vmatmul.mubr.msk.bf16.vlgmr.msra.gmra.mrb[0].mxu0 %vm315_vm5, %v900_v30  ;;  %840 = vmatprep.subr.bf16.mxu1 %v929_v4 }
 0x10f   : > { %430 = vmatpush1.bf16.msra.mxu0 %v272_v16  ;;  %v528_v36 = vpop.permute.xlu1 %527  ;;  %461 = vmatprep.mubr.bf16.mxu0 %v932_v12 }
 0x110   : > { %810 = vmatprep.subr.msk.bf16.mxu0 %vm269_vm1, %v268_v18  ;;  %v522_v39 = vpop.permute.xlu0 %521 }
 0x111   : > { %841 = vmatpush3.bf16.msra.mxu1 %v427_v37  ;;  %v534_v46 = vsel %vm533_vm6, %v522_v39, %v524_v35 }
 0x112   : > { %846 = vmatprep.subr.bf16.mxu1 %v929_v4 }
 0x113   : > { %432 = vmatpush1.bf16.msra.mxu0 %v421_v40  ;;  %v532_v42 = vpop.permute.xlu1 %531 }
 0x114   : > { %843 = vmatmul.mubr.msk.bf16.vlgmr.msra.gmra.mrb[4].mxu1 %vm315_vm5, %v901_v38  ;;  %553 = vmatprep.subr.bf16.mxu0 %v535_v41  ;;  %v551_v43 = vsel %vm269_vm1, %v532_v42, 0  ;;  %v530_v44 = vpop.permute.xlu0 %529 }
 0x115   : > { %847 = vmatpush3.bf16.msra.mxu1 %v526_v34  ;;  %850 = vmatprep.mubr.msk.bf16.mxu1 %vm930_vm2, %v929_v4  ;;  %v536_v47 = vsel %vm533_vm6, %v528_v36, %v530_v44  ;;  %v537_v48 = vsel %vm533_vm6, %v530_v44, %v532_v42 }
 0x116   : > { %848 = vmatprep.subr.bf16.mxu1 %v929_v4  ;;  %v545_v49 = vsel %vm269_vm1, %v536_v47, 0 }
 0x119   : > { %849 = vmatpush3.bf16.msra.mxu1 %v551_v43 }
 0x11a   : > { %811 = vmatmul.mubr.msk.bf16.vlgmr.msra.gmra.mrb[0].mxu0 %vm315_vm5, %v901_v38 }
 0x11b   : > { %554 = vmatpush1.bf16.msra.mxu0 %v534_v46  ;;  %585 = vmatprep.mubr.bf16.mxu0 %v932_v12 }
 0x11c   : > { %816 = vmatprep.subr.msk.bf16.mxu0 %vm269_vm1, %v537_v48  ;;  %851 = vmatmul.mubr.msk.bf16.vlgmr.msra.gmra.mrb[8].mxu1 %vm315_vm5, %v902_v45 }
 0x11f   : > { %556 = vmatpush1.bf16.msra.mxu0 %v545_v49 }
 0x124   : > { %v653_v1 = vpop.permute.xlu1 %652 }
 0x125   : > { %v648_v61 = vpop.permute.xlu0 %647 }
 0x126   : > { %817 = vmatmul.mubr.msk.bf16.vlgmr.msra.gmra.mrb[0].mxu0 %vm315_vm5, %v902_v45 }
 0x1df   : > { %v405_v50 = vpop.f32.mrb[0].mxu1 }
 0x1e0   : > { %v836_v51 = vpop.f32.mrb[1].mxu1 }
 0x1e1   : > { %v408_v52 = vpop.f32.mrb[2].mxu1 }
 0x1e2   : > { %v837_v53 = vpop.f32.mrb[3].mxu1 }
 0x1e7   : > { %v506_v54 = vpop.f32.mrb[4].mxu1 }
 0x1e8   : > { %v507_v55 = vadd.f32 %v506_v54, %v405_v50  ;;  %v844_v56 = vpop.f32.mrb[5].mxu1 }
 0x1e9   : > { %v509_v57 = vpop.f32.mrb[6].mxu1 }
 0x1ea   : > { %v510_v58 = vadd.f32 %v509_v57, %v408_v52  ;;  %v845_v59 = vpop.f32.mrb[7].mxu1 }
 0x1ef   : > { %v630_v60 = vpop.f32.mrb[8].mxu1 }
 0x1f0   : > { %v639_v62 = vadd.f32 %v630_v60, %v507_v55  ;;  %v852_v63 = vpop.f32.mrb[9].mxu1 }
 0x1f1   : > { %v633_v0 = vpop.f32.mrb[10].mxu1 }
 0x1f2   : > { %v657_v2 = vadd.f32 %v648_v61, %v639_v62  ;;  %v642_v3 = vadd.f32 %v633_v0, %v510_v58  ;;  %v853_v4 = vpop.f32.mrb[11].mxu1 }
 0x1f4   : > { %v663_v5 = vmax.f32 %v657_v2, 0.0  ;;  %v660_v6 = vadd.f32 %v653_v1, %v642_v3 }
 0x1f6   : > { %670 = vst.msk [vmem:[%s238_s10 + $0x10] sm:$0xff] %vm669_vm7, %v663_v5  ;;  %v666_v7 = vmax.f32 %v660_v6, 0.0 }
 0x1f8   : > { %673 = vst.msk [vmem:[%s238_s10 + $0x28] sm:$0xff] %vm669_vm7, %v666_v7 }
 0x1f9   : > { %v587_v8 = vpop.f32.mrb[0].mxu0 }
 0x1fa   : > { %v655_v9 = vadd.f32 %v648_v61, %v587_v8  ;;  %v589_v10 = vpop.f32.mrb[1].mxu0 }
 0x1fb   : > { %v656_v11 = vadd.f32 %v648_v61, %v589_v10  ;;  %v591_v12 = vpop.f32.mrb[2].mxu0 }
 0x1fc   : > { %v661_v13 = vmax.f32 %v655_v9, 0.0  ;;  %v658_v14 = vadd.f32 %v653_v1, %v591_v12  ;;  %v593_v15 = vpop.f32.mrb[3].mxu0 }
 0x1fd   : > { %v662_v16 = vmax.f32 %v656_v11, 0.0  ;;  %v659_v17 = vadd.f32 %v653_v1, %v593_v15 }
 0x1fe   : > { %667 = vst [vmem:[%s238_s10] sm:$0xff] %v661_v13  ;;  %v664_v18 = vmax.f32 %v658_v14, 0.0 }
 0x1ff   : > { %668 = vst [vmem:[%s238_s10 + $0x8] sm:$0xff] %v662_v16  ;;  %v665_v19 = vmax.f32 %v659_v17, 0.0 }
 0x200   : > { %671 = vst [vmem:[%s238_s10 + $0x18] sm:$0xff] %v664_v18 }
 0x201   : > { %672 = vst [vmem:[%s238_s10 + $0x20] sm:$0xff] %v665_v19 }
 0x202 PF: > { %s13_s14 = sadd.s32 1, %s925_s14   ;;  %s1053_s12 = smov %s921_s13 }
 0x203   : > { %p10_p5 = scmp.ge.s32.totalorder %s13_s14, 4   ;;  %s1054_s13 = smov %s1056_s15 }
 0x205   :  { %12 = sbr.rel (!%p10_p5) target bundleno = 2 (0x2), region = 70 }

</bundles_post_ra>
